<compile_context>
chip_gen: v5e
topology: v5e:2x2
jax: 0.10.0
libtpu: 0.0.40
codegen_flags: <defaults>
</compile_context>

<pallas_src>
from functools import partial

import jax
import jax.numpy as jnp
from jax import lax
from jax.experimental import pallas as pl
from jax.experimental.pallas import tpu as pltpu


_HEADROOM_BYTES = 16 << 20  # reserve for compiler-internal scratch


def attention_kernel(x_ref, wqkv_ref, wp_ref, o_ref, qkv_sc, ctx_sc,
                     *, num_heads, head_dim):
    # x_ref block: [Bt, S, C]; wqkv_ref: [C, 3*H*d]; wp_ref: [H*d, C]
    bt, S, C = x_ref.shape
    hd = num_heads * head_dim
    M = bt * S

    # --- Fused, batch-flattened QKV projection: [Bt*S, C] @ [C, 3*H*d] ---
    x2d = x_ref[...].reshape(M, C)
    qkv_sc[...] = jnp.dot(
        x2d, wqkv_ref[...], preferred_element_type=jnp.float32
    ).astype(qkv_sc.dtype)

    # --- Attention per (batch, head-pair); static loops (bt, H are small) ---
    for b in range(bt):
        r0 = b * S
        h = 0
        while h < num_heads:
            pair = 2 if (h + 1) < num_heads else 1
            w = pair * head_dim
            lo = h * head_dim

            # Read a 2*d-wide head-pair slab once (128 lanes when d=64) and
            # split in-register instead of three 64-wide slices per head.
            q_pair = qkv_sc[r0:r0 + S, lo:lo + w]
            k_pair = qkv_sc[r0:r0 + S, hd + lo:hd + lo + w]
            v_pair = qkv_sc[r0:r0 + S, 2 * hd + lo:2 * hd + lo + w]

            ctx_parts = []
            for j in range(pair):
                c0 = j * head_dim
                qj = q_pair[:, c0:c0 + head_dim]
                kj = k_pair[:, c0:c0 + head_dim]
                vj = v_pair[:, c0:c0 + head_dim]

                # scores: contract over d without materializing k.T
                s = lax.dot_general(qj, kj, (((1,), (1,)), ((), ())),
                                    preferred_element_type=jnp.float32)  # [S,S]

                # softmax (f32); divide via EUP approximate reciprocal
                s = s - jnp.max(s, axis=-1, keepdims=True)
                p = jnp.exp(s)
                p = p * pl.reciprocal(jnp.sum(p, axis=-1, keepdims=True),
                                      approx=True)

                ctx_parts.append(jnp.dot(p.astype(vj.dtype), vj,
                                         preferred_element_type=jnp.float32))

            ctx = ctx_parts[0] if pair == 1 else jnp.concatenate(ctx_parts, axis=1)
            # Paired store -> full-width unmasked vst when pair*d == 128.
            ctx_sc[r0:r0 + S, lo:lo + w] = ctx.astype(ctx_sc.dtype)
            h += pair

    # --- Fused, batch-flattened output projection: [Bt*S, H*d] @ [H*d, C] ---
    out2d = jnp.dot(ctx_sc[...], wp_ref[...], preferred_element_type=jnp.float32)
    o_ref[...] = out2d.reshape(bt, S, C).astype(o_ref.dtype)


def _device_vmem_capacity_bytes():
    """Physical VMEM per TensorCore (64 MiB on v7x, 128 MiB on v5e/v6e)."""
    try:
        cap = getattr(pltpu.get_tpu_info(), "vmem_capacity_bytes", None)
        if cap:
            return int(cap)
    except Exception:
        pass
    return 64 << 20  # conservative default (v7x per-core VMEM)


def _step_vmem_bytes(block_b, S, C, hd, itemsize):
    io_blocks = 2 * (2 * block_b * S * C * itemsize)   # x + out, double-buffered
    weights = (C * 3 * hd + hd * C) * itemsize         # single-buffered, resident
    slabs = block_b * S * (3 * hd + hd) * itemsize     # qkv + ctx scratch slabs
    interm = 6 * S * S * 4                             # f32 score/prob temporaries
    return io_blocks + weights + slabs + interm


def _pick_block_b(B, S, C, hd, itemsize, vmem_cap):
    """Largest batch block (<=8) that fits VMEM while keeping >=2 grid steps
    so both v7x TensorCores get work via the "parallel" batch axis."""
    best = 1
    for bb in range(1, min(B, 8) + 1):
        if B % bb:
            continue
        if B >= 2 and (B // bb) < 2:
            continue
        if _step_vmem_bytes(bb, S, C, hd, itemsize) + _HEADROOM_BYTES > vmem_cap:
            continue
        best = bb
    return best


def attention_with_einsum(x, q_param, k_param, v_param, p_param, *,
                          block_b=None, compute_dtype=None):
    """x: [B,S,C]; q/k/v_param: [C,H,d]; p_param: [H,d,C].

    compute_dtype: optional MXU dtype (e.g. jnp.bfloat16) for activations and
    weights; accumulation stays f32 and the output keeps x.dtype.  None keeps
    the caller's dtype (exact match to the PyTorch module numerics).
    """
    B, S, C = x.shape
    _, H, d = q_param.shape
    hd = H * d
    scale = d ** (-0.5)
    out_dtype = x.dtype
    cdt = jnp.dtype(compute_dtype) if compute_dtype is not None else jnp.dtype(x.dtype)

    # One-time weight transforms (wrapper glue):
    #  - fold the q scale into Wq,
    #  - concat Q/K/V into one lane-dense [C, 3*H*d] matrix,
    #  - flatten the output projection to [H*d, C].
    w_q = (q_param.astype(jnp.float32) * scale).reshape(C, hd)
    w_k = k_param.astype(jnp.float32).reshape(C, hd)
    w_v = v_param.astype(jnp.float32).reshape(C, hd)
    w_qkv = jnp.concatenate([w_q, w_k, w_v], axis=1).astype(cdt)   # [C, 3*H*d]
    w_p = p_param.reshape(hd, C).astype(cdt)                       # [H*d, C]
    x_c = x.astype(cdt)

    vmem_cap = _device_vmem_capacity_bytes()
    itemsize = cdt.itemsize
    if block_b is None:
        block_b = _pick_block_b(B, S, C, hd, itemsize, vmem_cap)
    assert B % block_b == 0, "block_b must divide batch"
    grid = (B // block_b,)

    need = _step_vmem_bytes(block_b, S, C, hd, itemsize)
    vmem_limit = max(32 << 20, min(need + (8 << 20), vmem_cap - (12 << 20)))
    vmem_limit = int(min(vmem_limit, vmem_cap - (8 << 20)))

    cost = pl.CostEstimate(
        flops=(2 * B * S * C * 3 * hd          # QKV projection
               + 4 * B * H * S * S * d         # scores + PV
               + 2 * B * S * hd * C),          # output projection
        transcendentals=B * H * S * S,         # softmax exp
        bytes_accessed=(2 * B * S * C * itemsize
                        + (C * 3 * hd + hd * C) * itemsize),
    )

    kernel = partial(attention_kernel, num_heads=H, head_dim=d)
    return pl.pallas_call(
        kernel,
        out_shape=jax.ShapeDtypeStruct((B, S, C), out_dtype),
        grid=grid,
        in_specs=[
            pl.BlockSpec((block_b, S, C), lambda i: (i, 0, 0)),
            # Constant weights: whole-array resident in VMEM, single-buffered
            # (no per-step pipelining / double-buffer waste).
            pl.BlockSpec(memory_space=pltpu.MemorySpace.VMEM),
            pl.BlockSpec(memory_space=pltpu.MemorySpace.VMEM),
        ],
        out_specs=pl.BlockSpec((block_b, S, C), lambda i: (i, 0, 0)),
        scratch_shapes=[
            pltpu.VMEM((block_b * S, 3 * hd), cdt),   # fused QKV slab
            pltpu.VMEM((block_b * S, hd), cdt),       # per-head context slab
        ],
        compiler_params=pltpu.CompilerParams(
            dimension_semantics=("parallel",),
            vmem_limit_bytes=vmem_limit),
        cost_estimate=cost,
    )(x_c, w_qkv, w_p)


def reference(x, q_param, k_param, v_param, p_param):
    _, H, d = q_param.shape
    scale = d ** (-0.5)
    q = jnp.einsum('bsc,chd->bshd', x, q_param) * scale
    k = jnp.einsum('btc,chd->bthd', x, k_param)
    v = jnp.einsum('btc,chd->bthd', x, v_param)
    attn = jax.nn.softmax(jnp.einsum('bshd,bthd->bhst', q, k), axis=-1)
    y = jnp.einsum('bhst,bthd->bshd', attn, v)
    return jnp.einsum('bshd,hdc->bsc', y, p_param)


if __name__ == "__main__":
    key = jax.random.PRNGKey(0)
    kx, kq, kk, kv, kp, kx2 = jax.random.split(key, 6)

    B, S, C, H = 2, 8, 32, 4
    d = C // H  # head_dim = 8
    bound = C ** (-0.5)

    x = jax.random.normal(kx, (B, S, C), dtype=jnp.float32)
    q_param = jax.random.uniform(kq, (C, H, d), jnp.float32, -bound, bound)
    k_param = jax.random.uniform(kk, (C, H, d), jnp.float32, -bound, bound)
    v_param = jax.random.uniform(kv, (C, H, d), jnp.float32, -bound, bound)
    p_param = jax.random.uniform(kp, (H, d, C), jnp.float32, -bound, bound)

    # 1) Exact-dtype path (auto block_b -> 1, grid length 2).
    out = jax.block_until_ready(
        attention_with_einsum(x, q_param, k_param, v_param, p_param))
    ref = reference(x, q_param, k_param, v_param, p_param)
    assert out.shape == (B, S, C)
    # Tolerance accommodates the EUP approximate-reciprocal softmax normalization.
    assert jnp.allclose(out, ref, atol=2e-3, rtol=2e-3), "f32 path mismatch"

    # 2) Batch-flattened projections with block_b=2 (+ bf16 MXU fast path).
    B2 = 4
    x2 = jax.random.normal(kx2, (B2, S, C), dtype=jnp.float32)
    ref2 = reference(x2, q_param, k_param, v_param, p_param)

    out2 = jax.block_until_ready(
        attention_with_einsum(x2, q_param, k_param, v_param, p_param, block_b=2))
    assert jnp.allclose(out2, ref2, atol=2e-3, rtol=2e-3), "block_b=2 path mismatch"

    out3 = jax.block_until_ready(
        attention_with_einsum(x2, q_param, k_param, v_param, p_param,
                              block_b=2, compute_dtype=jnp.bfloat16))
    assert out3.dtype == x2.dtype
    assert jnp.allclose(out3, ref2, atol=5e-2, rtol=5e-2), "bf16 path mismatch"

    print("KERNEL_OK")
</pallas_src>

<mosaic_0001>
module attributes {stable_mosaic.version = 11 : i64} {
  func.func @attention_kernel(%arg0: i32, %arg1: memref<1x8x32xf32, #tpu.memory_space<vmem>>, %arg2: memref<32x96xf32, #tpu.memory_space<vmem>>, %arg3: memref<32x32xf32, #tpu.memory_space<vmem>>, %arg4: memref<1x8x32xf32, #tpu.memory_space<vmem>>, %arg5: memref<8x96xf32, #tpu.memory_space<vmem>>, %arg6: memref<8x32xf32, #tpu.memory_space<vmem>>) attributes {dimension_semantics = [#tpu.dimension_semantics<parallel>], iteration_bounds = array<i64: 2>, scalar_prefetch = 0 : i64, scratch_operands = 2 : i64, tpu.core_type = #tpu.core_type<tc>, window_params = [{transform_indices = @transform_0, window_bounds = array<i64: 1, 8, 32>}, {pipeline_mode = #tpu.pipeline_mode<synchronous>, transform_indices = @transform_1, window_bounds = array<i64: 32, 96>}, {pipeline_mode = #tpu.pipeline_mode<synchronous>, transform_indices = @transform_2, window_bounds = array<i64: 32, 32>}, {transform_indices = @transform_3, window_bounds = array<i64: 1, 8, 32>}]} {
    %c0 = arith.constant 0 : index
    %c0_0 = arith.constant 0 : index
    %c0_1 = arith.constant 0 : index
    %0 = vector.load %arg1[%c0, %c0_0, %c0_1] : memref<1x8x32xf32, #tpu.memory_space<vmem>>, vector<1x8x32xf32>
    %1 = vector.shape_cast %0 : vector<1x8x32xf32> to vector<8x32xf32>
    %c0_2 = arith.constant 0 : index
    %c0_3 = arith.constant 0 : index
    %2 = vector.load %arg2[%c0_2, %c0_3] : memref<32x96xf32, #tpu.memory_space<vmem>>, vector<32x96xf32>
    %cst = arith.constant dense<0.000000e+00> : vector<8x96xf32>
    %3 = tpu.matmul %1, %2, %cst {dimension_numbers = #tpu.dot_dimension_numbers<[1], [0], [0], [1], [0, 0, 1, 1], [], []>} : vector<8x32xf32>, vector<32x96xf32>, vector<8x96xf32> -> vector<8x96xf32>
    %c0_4 = arith.constant 0 : index
    %c0_5 = arith.constant 0 : index
    %4 = vector.load %arg5[%c0_4, %c0_5] : memref<8x96xf32, #tpu.memory_space<vmem>>, vector<8x96xf32>
    tpu.vector_store %arg5[%c0_4, %c0_5], %3 {strides = array<i32>} : memref<8x96xf32, #tpu.memory_space<vmem>>, vector<8x96xf32>,
    %c0_6 = arith.constant 0 : index
    %c0_7 = arith.constant 0 : index
    %5 = vector.load %arg5[%c0_6, %c0_7] : memref<8x96xf32, #tpu.memory_space<vmem>>, vector<8x16xf32>
    %c0_8 = arith.constant 0 : index
    %c32 = arith.constant 32 : index
    %6 = vector.load %arg5[%c0_8, %c32] : memref<8x96xf32, #tpu.memory_space<vmem>>, vector<8x16xf32>
    %c0_9 = arith.constant 0 : index
    %c64 = arith.constant 64 : index
    %7 = vector.load %arg5[%c0_9, %c64] : memref<8x96xf32, #tpu.memory_space<vmem>>, vector<8x16xf32>
    %8 = vector.extract_strided_slice %5 {offsets = [0, 0], sizes = [8, 8], strides = [1, 1]} : vector<8x16xf32> to vector<8x8xf32>
    %9 = vector.extract_strided_slice %6 {offsets = [0, 0], sizes = [8, 8], strides = [1, 1]} : vector<8x16xf32> to vector<8x8xf32>
    %10 = vector.extract_strided_slice %7 {offsets = [0, 0], sizes = [8, 8], strides = [1, 1]} : vector<8x16xf32> to vector<8x8xf32>
    %cst_10 = arith.constant dense<0.000000e+00> : vector<8x8xf32>
    %11 = tpu.matmul %8, %9, %cst_10 {dimension_numbers = #tpu.dot_dimension_numbers<[1], [1], [0], [0], [0, 0, 1, 0], [], []>} : vector<8x8xf32>, vector<8x8xf32>, vector<8x8xf32> -> vector<8x8xf32>
    %cst_11 = arith.constant dense<0xFF800000> : vector<8xf32>
    %12 = vector.multi_reduction <maximumf>, %11, %cst_11 [1] : vector<8x8xf32> to vector<8xf32>
    %13 = vector.shape_cast %12 : vector<8xf32> to vector<8x1xf32>
    %14 = vector.broadcast %13 : vector<8x1xf32> to vector<8x8xf32>
    %15 = arith.subf %11, %14 : vector<8x8xf32>
    %16 = math.exp %15 : vector<8x8xf32>
    %cst_12 = arith.constant dense<0.000000e+00> : vector<8xf32>
    %17 = vector.multi_reduction <add>, %16, %cst_12 [1] : vector<8x8xf32> to vector<8xf32>
    %18 = vector.shape_cast %17 : vector<8xf32> to vector<8x1xf32>
    %19 = tpu.reciprocal %18 {approx = true} : vector<8x1xf32> -> vector<8x1xf32>
    %20 = vector.broadcast %19 : vector<8x1xf32> to vector<8x8xf32>
    %21 = arith.mulf %16, %20 : vector<8x8xf32>
    %cst_13 = arith.constant dense<0.000000e+00> : vector<8x8xf32>
    %22 = tpu.matmul %21, %10, %cst_13 {dimension_numbers = #tpu.dot_dimension_numbers<[1], [0], [0], [1], [0, 0, 1, 1], [], []>} : vector<8x8xf32>, vector<8x8xf32>, vector<8x8xf32> -> vector<8x8xf32>
    %23 = vector.extract_strided_slice %5 {offsets = [0, 8], sizes = [8, 8], strides = [1, 1]} : vector<8x16xf32> to vector<8x8xf32>
    %24 = vector.extract_strided_slice %6 {offsets = [0, 8], sizes = [8, 8], strides = [1, 1]} : vector<8x16xf32> to vector<8x8xf32>
    %25 = vector.extract_strided_slice %7 {offsets = [0, 8], sizes = [8, 8], strides = [1, 1]} : vector<8x16xf32> to vector<8x8xf32>
    %cst_14 = arith.constant dense<0.000000e+00> : vector<8x8xf32>
    %26 = tpu.matmul %23, %24, %cst_14 {dimension_numbers = #tpu.dot_dimension_numbers<[1], [1], [0], [0], [0, 0, 1, 0], [], []>} : vector<8x8xf32>, vector<8x8xf32>, vector<8x8xf32> -> vector<8x8xf32>
    %cst_15 = arith.constant dense<0xFF800000> : vector<8xf32>
    %27 = vector.multi_reduction <maximumf>, %26, %cst_15 [1] : vector<8x8xf32> to vector<8xf32>
    %28 = vector.shape_cast %27 : vector<8xf32> to vector<8x1xf32>
    %29 = vector.broadcast %28 : vector<8x1xf32> to vector<8x8xf32>
    %30 = arith.subf %26, %29 : vector<8x8xf32>
    %31 = math.exp %30 : vector<8x8xf32>
    %cst_16 = arith.constant dense<0.000000e+00> : vector<8xf32>
    %32 = vector.multi_reduction <add>, %31, %cst_16 [1] : vector<8x8xf32> to vector<8xf32>
    %33 = vector.shape_cast %32 : vector<8xf32> to vector<8x1xf32>
    %34 = tpu.reciprocal %33 {approx = true} : vector<8x1xf32> -> vector<8x1xf32>
    %35 = vector.broadcast %34 : vector<8x1xf32> to vector<8x8xf32>
    %36 = arith.mulf %31, %35 : vector<8x8xf32>
    %cst_17 = arith.constant dense<0.000000e+00> : vector<8x8xf32>
    %37 = tpu.matmul %36, %25, %cst_17 {dimension_numbers = #tpu.dot_dimension_numbers<[1], [0], [0], [1], [0, 0, 1, 1], [], []>} : vector<8x8xf32>, vector<8x8xf32>, vector<8x8xf32> -> vector<8x8xf32>
    %38 = tpu.concatenate %22, %37 in 1 : vector<8x8xf32>, vector<8x8xf32> -> vector<8x16xf32>
    %c0_18 = arith.constant 0 : index
    %c0_19 = arith.constant 0 : index
    %39 = vector.load %arg6[%c0_18, %c0_19] : memref<8x32xf32, #tpu.memory_space<vmem>>, vector<8x16xf32>
    tpu.vector_store %arg6[%c0_18, %c0_19], %38 {strides = array<i32>} : memref<8x32xf32, #tpu.memory_space<vmem>>, vector<8x16xf32>,
    %c0_20 = arith.constant 0 : index
    %c16 = arith.constant 16 : index
    %40 = vector.load %arg5[%c0_20, %c16] : memref<8x96xf32, #tpu.memory_space<vmem>>, vector<8x16xf32>
    %c0_21 = arith.constant 0 : index
    %c48 = arith.constant 48 : index
    %41 = vector.load %arg5[%c0_21, %c48] : memref<8x96xf32, #tpu.memory_space<vmem>>, vector<8x16xf32>
    %c0_22 = arith.constant 0 : index
    %c80 = arith.constant 80 : index
    %42 = vector.load %arg5[%c0_22, %c80] : memref<8x96xf32, #tpu.memory_space<vmem>>, vector<8x16xf32>
    %43 = vector.extract_strided_slice %40 {offsets = [0, 0], sizes = [8, 8], strides = [1, 1]} : vector<8x16xf32> to vector<8x8xf32>
    %44 = vector.extract_strided_slice %41 {offsets = [0, 0], sizes = [8, 8], strides = [1, 1]} : vector<8x16xf32> to vector<8x8xf32>
    %45 = vector.extract_strided_slice %42 {offsets = [0, 0], sizes = [8, 8], strides = [1, 1]} : vector<8x16xf32> to vector<8x8xf32>
    %cst_23 = arith.constant dense<0.000000e+00> : vector<8x8xf32>
    %46 = tpu.matmul %43, %44, %cst_23 {dimension_numbers = #tpu.dot_dimension_numbers<[1], [1], [0], [0], [0, 0, 1, 0], [], []>} : vector<8x8xf32>, vector<8x8xf32>, vector<8x8xf32> -> vector<8x8xf32>
    %cst_24 = arith.constant dense<0xFF800000> : vector<8xf32>
    %47 = vector.multi_reduction <maximumf>, %46, %cst_24 [1] : vector<8x8xf32> to vector<8xf32>
    %48 = vector.shape_cast %47 : vector<8xf32> to vector<8x1xf32>
    %49 = vector.broadcast %48 : vector<8x1xf32> to vector<8x8xf32>
    %50 = arith.subf %46, %49 : vector<8x8xf32>
    %51 = math.exp %50 : vector<8x8xf32>
    %cst_25 = arith.constant dense<0.000000e+00> : vector<8xf32>
    %52 = vector.multi_reduction <add>, %51, %cst_25 [1] : vector<8x8xf32> to vector<8xf32>
    %53 = vector.shape_cast %52 : vector<8xf32> to vector<8x1xf32>
    %54 = tpu.reciprocal %53 {approx = true} : vector<8x1xf32> -> vector<8x1xf32>
    %55 = vector.broadcast %54 : vector<8x1xf32> to vector<8x8xf32>
    %56 = arith.mulf %51, %55 : vector<8x8xf32>
    %cst_26 = arith.constant dense<0.000000e+00> : vector<8x8xf32>
    %57 = tpu.matmul %56, %45, %cst_26 {dimension_numbers = #tpu.dot_dimension_numbers<[1], [0], [0], [1], [0, 0, 1, 1], [], []>} : vector<8x8xf32>, vector<8x8xf32>, vector<8x8xf32> -> vector<8x8xf32>
    %58 = vector.extract_strided_slice %40 {offsets = [0, 8], sizes = [8, 8], strides = [1, 1]} : vector<8x16xf32> to vector<8x8xf32>
    %59 = vector.extract_strided_slice %41 {offsets = [0, 8], sizes = [8, 8], strides = [1, 1]} : vector<8x16xf32> to vector<8x8xf32>
    %60 = vector.extract_strided_slice %42 {offsets = [0, 8], sizes = [8, 8], strides = [1, 1]} : vector<8x16xf32> to vector<8x8xf32>
    %cst_27 = arith.constant dense<0.000000e+00> : vector<8x8xf32>
    %61 = tpu.matmul %58, %59, %cst_27 {dimension_numbers = #tpu.dot_dimension_numbers<[1], [1], [0], [0], [0, 0, 1, 0], [], []>} : vector<8x8xf32>, vector<8x8xf32>, vector<8x8xf32> -> vector<8x8xf32>
    %cst_28 = arith.constant dense<0xFF800000> : vector<8xf32>
    %62 = vector.multi_reduction <maximumf>, %61, %cst_28 [1] : vector<8x8xf32> to vector<8xf32>
    %63 = vector.shape_cast %62 : vector<8xf32> to vector<8x1xf32>
    %64 = vector.broadcast %63 : vector<8x1xf32> to vector<8x8xf32>
    %65 = arith.subf %61, %64 : vector<8x8xf32>
    %66 = math.exp %65 : vector<8x8xf32>
    %cst_29 = arith.constant dense<0.000000e+00> : vector<8xf32>
    %67 = vector.multi_reduction <add>, %66, %cst_29 [1] : vector<8x8xf32> to vector<8xf32>
    %68 = vector.shape_cast %67 : vector<8xf32> to vector<8x1xf32>
    %69 = tpu.reciprocal %68 {approx = true} : vector<8x1xf32> -> vector<8x1xf32>
    %70 = vector.broadcast %69 : vector<8x1xf32> to vector<8x8xf32>
    %71 = arith.mulf %66, %70 : vector<8x8xf32>
    %cst_30 = arith.constant dense<0.000000e+00> : vector<8x8xf32>
    %72 = tpu.matmul %71, %60, %cst_30 {dimension_numbers = #tpu.dot_dimension_numbers<[1], [0], [0], [1], [0, 0, 1, 1], [], []>} : vector<8x8xf32>, vector<8x8xf32>, vector<8x8xf32> -> vector<8x8xf32>
    %73 = tpu.concatenate %57, %72 in 1 : vector<8x8xf32>, vector<8x8xf32> -> vector<8x16xf32>
    %c0_31 = arith.constant 0 : index
    %c16_32 = arith.constant 16 : index
    %74 = vector.load %arg6[%c0_31, %c16_32] : memref<8x32xf32, #tpu.memory_space<vmem>>, vector<8x16xf32>
    tpu.vector_store %arg6[%c0_31, %c16_32], %73 {strides = array<i32>} : memref<8x32xf32, #tpu.memory_space<vmem>>, vector<8x16xf32>,
    %c0_33 = arith.constant 0 : index
    %c0_34 = arith.constant 0 : index
    %75 = vector.load %arg6[%c0_33, %c0_34] : memref<8x32xf32, #tpu.memory_space<vmem>>, vector<8x32xf32>
    %c0_35 = arith.constant 0 : index
    %c0_36 = arith.constant 0 : index
    %76 = vector.load %arg3[%c0_35, %c0_36] : memref<32x32xf32, #tpu.memory_space<vmem>>, vector<32x32xf32>
    %cst_37 = arith.constant dense<0.000000e+00> : vector<8x32xf32>
    %77 = tpu.matmul %75, %76, %cst_37 {dimension_numbers = #tpu.dot_dimension_numbers<[1], [0], [0], [1], [0, 0, 1, 1], [], []>} : vector<8x32xf32>, vector<32x32xf32>, vector<8x32xf32> -> vector<8x32xf32>
    %78 = vector.shape_cast %77 : vector<8x32xf32> to vector<1x8x32xf32>
    %c0_38 = arith.constant 0 : index
    %c0_39 = arith.constant 0 : index
    %c0_40 = arith.constant 0 : index
    %79 = vector.load %arg4[%c0_38, %c0_39, %c0_40] : memref<1x8x32xf32, #tpu.memory_space<vmem>>, vector<1x8x32xf32>
    tpu.vector_store %arg4[%c0_38, %c0_39, %c0_40], %78 {strides = array<i32>} : memref<1x8x32xf32, #tpu.memory_space<vmem>>, vector<1x8x32xf32>,
    return
  }
  func.func @transform_0(%arg0: i32) -> (i32, i32, i32) {
    %c0_i32 = arith.constant 0 : i32
    %c0_i32_0 = arith.constant 0 : i32
    %c0_i32_1 = arith.constant 0 : i32
    return %arg0, %c0_i32, %c0_i32_0 : i32, i32, i32
  }
  func.func @transform_1(%arg0: i32) -> (i32, i32) {
    %c0_i32 = arith.constant 0 : i32
    %c0_i32_0 = arith.constant 0 : i32
    %c0_i32_1 = arith.constant 0 : i32
    return %c0_i32, %c0_i32_0 : i32, i32
  }
  func.func @transform_2(%arg0: i32) -> (i32, i32) {
    %c0_i32 = arith.constant 0 : i32
    %c0_i32_0 = arith.constant 0 : i32
    %c0_i32_1 = arith.constant 0 : i32
    return %c0_i32, %c0_i32_0 : i32, i32
  }
  func.func @transform_3(%arg0: i32) -> (i32, i32, i32) {
    %c0_i32 = arith.constant 0 : i32
    %c0_i32_0 = arith.constant 0 : i32
    %c0_i32_1 = arith.constant 0 : i32
    return %arg0, %c0_i32, %c0_i32_0 : i32, i32, i32
  }
}

</mosaic_0001>

<bundles_post_ra>
// kernel: tpu_custom_call.1
= control target key start
LH: loop header
LB: loop body
LE: loop exit
PB: predicated region body
PF: predicated region fallthrough
CT: control target
= control target key end

     0   :  { %8 = vsyncpa [#allocation5], 0  ;;  %s1182_s0 = inlined_call_operand.hbm [shape: f32[2,8,32], index: 0, kind: input, shape index: {}]   ;;  %s1183_s1 = inlined_call_operand.hbm [shape: f32[32,96], index: 1, kind: input, shape index: {}]   ;;  %s1184_s2 = inlined_call_operand.hbm [shape: f32[32,32], index: 2, kind: input, shape index: {}]   ;;  %s1185_s3 = inlined_call_operand.hbm [shape: f32[2,8,32], index: 3, kind: output, shape index: {}]  }
   0x1   :  { %10 = vsyncpa [#allocation5 + $0x1], 0 }
   0x2   :  { %11 = vsyncpa [#allocation8], 0 }
   0x3   :  { %12 = vsyncpa [#allocation6], 0 }
   0x4   :  { %14 = vsyncpa [#allocation6 + $0x1], 0  ;;  %s994_s12 = smov 0   ;;  %s996_s13 = smov 0  }
   0x5   :  { %s998_s14 = smov 0   ;;  %s1000_s15 = smov 0  }
   0x6 LB: > { %s130_s18 = sshll.u32 %s1183_s1, 4  ;;  %s1018_s19 = sadd.s32 4294967295, %s955_s15   ;;  %s955_s15 = sphi %s1000_s15, %s1196_s15   ;;  %s951_s14 = sphi %s998_s14, %s1195_s14   ;;  %s947_s13 = sphi %s996_s13, %s1194_s13   ;;  %s943_s12 = sphi %s994_s12, %s1193_s12   ;;  %s131_s18 = int_to_ptr.hbm [resolvable:$true] %s130_s18 }
   0x7   : > { %p668_p0 = scmp.ge.s32.totalorder %s955_s15, 1  ;;  %p41_p1 = scmp.eq.s32.totalorder %s1018_s19, 0 }
   0x8   : > { %p119_p2 = scmp.lt.s32.totalorder %s955_s15, 3  ;;  %s957_s21 = smov [#allocation7]  }
   0x9   : > { %s132_s22 = sshll.u32 %s957_s21, 4  ;;  %s144_s25 = sshll.u32 %s1184_s2, 4  ;;  %s133_s22 = int_to_ptr.vmem [resolvable:$true] %s132_s22  ;;  %s145_s25 = int_to_ptr.hbm [resolvable:$true] %s144_s25 }
   0xa   : > { %p1023_p3 = pnand %p668_p0, %p119_p2  ;;  %s958_s26 = smov [#allocation9]  }
   0xb   : > { %s146_s27 = sshll.u32 %s958_s26, 4  ;;  %s959_s28 = smov 128   ;;  %s147_s27 = int_to_ptr.vmem [resolvable:$true] %s146_s27 }
   0xc   : > { %p709_p4 = pneg %p1023_p3  ;;  %s960_s29 = smov 8  }
   0xd   : > { %s667_s30 = sadd.s32 4294967294, %s955_s15   ;;  %s1037_s4 = sadd.s32 1, %s955_s15  }
   0xe   : > { %p710_p6 = pnand %p709_p4, %p41_p1  ;;  %s24_s5 = ssub.s32 %s955_s15, %s1037_s4 }
   0xf   : > { %s27_s6 = sadd.s32 1, %s951_s14  ;;  %p25_p7 = scmp.eq.s32.totalorder %s24_s5, 0 }
  0x10   : > { %712 = dma.hbm_to_vmem [thread:$0]  (!%p710_p6), %s131_s18, 512, %s133_s22, [#allocation8], %s959_s28, %s959_s28, %s960_s29  }
  0x11   : > { %715 = dma.hbm_to_vmem [thread:$0]  (!%p710_p6), %s145_s25, 512, %s147_s27, [#allocation8], %s959_s28, %s959_s28, %s960_s29  }
  0x12   : > { %p34_p8 = scmp.ne.s32.totalorder %s951_s14, %s947_s13  ;;  %p35_p9 = scmp.eq.s32.totalorder %s955_s15, 0 }
  0x13   : > { %p40_p10 = scmp.ne.s32.totalorder %s947_s13, %s943_s12  ;;  %p106_p13 = scmp.eq.s32.totalorder %s1018_s19, 1 }
  0x14   : > { %s1048_s7 = scalar_select %p25_p7, %s951_s14, %s27_s6  }
  0x15   : > { %p1050_p11 = por %p35_p9, %p34_p8  ;;  %p1056_p12 = por %p41_p1, %p40_p10 }
  0x16   : > { %p112_p0 = scmp.eq.s32.totalorder %s667_s30, 1  ;;  %p726_p2 = scmp.lt.s32.totalorder %s955_s15, 2 }
  0x17   : > { %s160_s10 = sand.u32 1, %s951_s14   ;;  %p1063_p4 = por %p106_p13, %p34_p8 }
  0x18   : > { %p1067_p6 = por %p112_p0, %p40_p10  ;;  %s672_s17 = sshll.u32 %s160_s10, 3 }
  0x19   : > { %s673_s18 = sshll.u32 %s955_s15, 3  ;;  %s164_s24 = scalar_lea.vmem [#allocation4], %s672_s17 }
  0x1a   : > { %s168_s23 = scalar_lea.hbm %s1182_s0, %s673_s18  ;;  %s172_s25 = sshll.u32 %s164_s24, 4  ;;  %s173_s25 = int_to_ptr.vmem [resolvable:$true] %s172_s25 }
  0x1b   : > { %s170_s26 = sshll.u32 %s168_s23, 4  ;;  %p1077_p7 = pnand %p726_p2, %p1050_p11  ;;  %s171_s26 = int_to_ptr.hbm [resolvable:$true] %s170_s26 }
  0x1c   : > { %s161_s28 = scalar_lea.sflag [#allocation5], %s160_s10  ;;  %s855_s29 = sshra.s32 %s171_s26, 4  ;;  %s856_s29 = int_to_ptr.hbm [resolvable:$true] %s855_s29 }
  0x1d   : > { %s857_s30 = scalar_lea.hbm %s856_s29, 8  ;;  %p859_p9 = pneg %p1077_p7 }
  0x1e   : > { %p858_p8 = scmp.ne.s32.totalorder %s856_s29, %s857_s30  ;;  %s862_s17 = scalar_lea.hbm %s1182_s0, 16 }
  0x1f   : > { %p863_p11 = scmp.lt.s32.totalorder %s856_s29, %s1182_s0  ;;  %p864_p0 = scmp.lt.s32.totalorder %s862_s17, %s857_s30 }
  0x20   : > { %p860_p10 = pnand %p859_p9, %p858_p8 }
  0x21   : > { %p865_p2 = por %p864_p0, %p863_p11 }
  0x22   : > { %p861_p13 = pneg %p860_p10 }
  0x24   : > { %p866_p5 = pnand %p865_p2, %p861_p13 }
  0x26   : > { %869 = shalt.err (!%p866_p5)
}
  0x27   : > { %719 = dma.hbm_to_vmem [thread:$0]  (!%p1077_p7), %s171_s26, 128, %s173_s25, %s161_s28  }
  0x28   : > { %181 = sbr.rel (%p1023_p3) target bundleno = 1212 (0x4bc), region = 32  ;;  %s1094_s10 = sand.u32 (!%p1023_p3), 1, %s947_s13  }
  0x29   : > { %s675_s21 = sshll.u32 (!%p1023_p3), %s1094_s10, 3  ;;  %s184_s22 = scalar_lea.sflag (!%p1023_p3), [#allocation5], %s1094_s10 }
  0x2a   : > { %s187_s23 = scalar_lea.vmem (!%p1023_p3), [#allocation4], %s675_s21 }
  0x2d   : > { %930 = dma.done.wait (%p1056_p12), %s184_s22, 128  }
  0x2e   : > { %932 = vsyncadd (%p1056_p12), %s184_s22, 4294967168 }
  0x2f   : > { %934 = dma.done.wait (%p41_p1), [#allocation8], 1024  }
  0x30   : > { %936 = vsyncadd (%p41_p1), [#allocation8], 4294966272  ;;  %v225_v0 = vld [vmem:[#allocation7 + $0x18] sm:$0xff]  ;;  %v224_v1 = vld [vmem:[#allocation7 + $0x10] sm:$0xff]  ;;  %vm226_vm0 = vcmask 261120   ;;  %vm250_vm1 = vcmask 785408  }
  0x31   : > { %242 = vmatpush.msra.mxu0 %v225_v0  ;;  %v223_v2 = vld [vmem:[#allocation7 + $0x8] sm:$0xff]  ;;  %v222_v3 = vld [vmem:[#allocation7] sm:$0xff]  ;;  %v221_v4 = vld [vmem:[%s187_s23] sm:$0xff]  ;;  %s961_s20 = smov 104   ;;  %s962_s9 = smov 120   ;;  %vm256_vm2 = vcmask 64512  }
  0x32   : > { %s963_s24 = smov 96   ;;  %s964_s25 = smov 80   ;;  %vm388_vm3 = vcmask 130048   ;;  %vm531_vm4 = vcmask 261248  }
  0x33   : > { %243 = vmatpush.msra.mxu0 %v224_v1  ;;  %s965_s26 = smov 72   ;;  %s966_s27 = smov 88  }
  0x34   : > { %s967_s28 = smov 112   ;;  %s968_s29 = smov 64  }
  0x35   : > { %244 = vmatpush.msra.mxu0 %v223_v2  ;;  %s969_s30 = smov 40   ;;  %s970_s5 = smov 56   ;;  %v537_v2 = vld [vmem:[#allocation9 + $0x18] sm:$0xff] }
  0x36   : > { %s971_s6 = smov 48   ;;  %s972_s17 = smov 8  }
  0x37   : > { %245 = vmatpush.msra.mxu0 %v222_v3  ;;  %s973_s18 = smov 16   ;;  %v536_v3 = vld [vmem:[#allocation9 + $0x10] sm:$0xff]  ;;  %s694_s8 = sshll.u32 %s1018_s19, 3 }
  0x38   : > { %679 = vmatmul.msk.f32.vlgmr.msra.gmra.mxu0 %vm226_vm0, %v221_v4  ;;  %v535_v4 = vld [vmem:[#allocation9 + $0x8] sm:$0xff] }
  0xb5   : > { %v247_v5 = vpop.f32.mrf.mxu0 }
  0xb6   : > { %251 = vst.msk [vmem:[#allocation2] sm:$0xff] %vm250_vm1, %v247_v5  ;;  %v534_v5 = vld [vmem:[#allocation9] sm:$0xff] }
  0xbd   : > { %v1109_v6 = vld [vmem:[#allocation2] sm:$0xff] }
  0xbe   : > { %457 = vrot.lane.b32.xlu2 %v1109_v6, %s961_s20  ;;  %318 = vrot.lane.b32.xlu1 %v1109_v6, %s962_s9  ;;  %s573_s20 = scalar_lea.hbm %s1185_s3, %s694_s8  ;;  %s220_s9 = scalar_lea.vmem [#allocation10], %s675_s21 }
  0xbf   : > { %254 = vrot.lane.b32.xlu0 %v1109_v6, %s963_s24  ;;  %s575_s24 = sshll.u32 %s220_s9, 4  ;;  %s576_s24 = int_to_ptr.vmem [resolvable:$true] %s575_s24 }
  0xc6   : > { %394 = vrot.lane.b32.xlu2 %v1109_v6, %s964_s25  ;;  %459 = vrot.lane.b32.xlu1 %v1109_v6, %s965_s26  ;;  %s577_s25 = sshll.u32 %s573_s20, 4  ;;  %s563_s26 = scalar_lea.sflag [#allocation6], %s1094_s10  ;;  %s578_s25 = int_to_ptr.hbm [resolvable:$true] %s577_s25 }
  0xc7   : > { %320 = vrot.lane.b32.xlu0 %v1109_v6, %s966_s27  ;;  %s899_s27 = sshra.s32 %s578_s25, 4  ;;  %s900_s27 = int_to_ptr.hbm [resolvable:$true] %s899_s27 }
  0xc8   : > { %p906_p12 = scmp.lt.s32.totalorder %s900_s27, %s1185_s3 }
  0xcf   : > { %392 = vrot.lane.b32.xlu0 %v1109_v6, %s967_s28  ;;  %s901_s28 = scalar_lea.hbm %s900_s27, 8 }
  0xd0   : > { %p902_p1 = scmp.ne.s32.totalorder %s900_s27, %s901_s28 }
  0xd2   : > { %p903_p3 = pnand %p902_p1, %p1063_p4 }
  0xd4   : > { %p904_p5 = pneg %p903_p3 }
 0x118   : > { %v458_v7 = vpop.permute.xlu2 %457 }
 0x120   : > { %v395_v10 = vpop.permute.xlu2 %394 }
 0x130   : > { %v319_v8 = vpop.permute.xlu1 %318 }
 0x131   : > { %v255_v9 = vpop.permute.xlu0 %254 }
 0x132   : > { %680 = vmatpush.xpose.msk.msra.mxu1 %vm256_vm2, %v255_v9 }
 0x135   : > { %681 = vmatmul.msk.f32.vlgmr.msra.gmra.mxu1 %vm256_vm2, %v1109_v6 }
 0x136   : > { %686 = vmatpush.xpose.msk.msrb.mxu1 %vm256_vm2, %v395_v10 }
 0x138   : > { %v460_v11 = vpop.permute.xlu1 %459 }
 0x139   : > { %v321_v12 = vpop.permute.xlu0 %320  ;;  %689 = vmatpush.xpose.msk.msrb.mxu0 %vm256_vm2, %v460_v11 }
 0x13a   : > { %683 = vmatpush.xpose.msk.msra.mxu3 %vm256_vm2, %v321_v12  ;;  %553 = vmatpush.msra.mxu1 %v537_v2 }
 0x13c   : > { %690 = vmatmul.msk.f32.vlgmr.msrb.gmra.mxu0 %vm256_vm2, %v458_v7  ;;  %554 = vmatpush.msra.mxu1 %v536_v3 }
 0x13d   : > { %684 = vmatmul.msk.f32.vlgmr.msra.gmra.mxu3 %vm256_vm2, %v319_v8 }
 0x13e   : > { %555 = vmatpush.msra.mxu1 %v535_v4 }
 0x140   : > { %556 = vmatpush.msra.mxu1 %v534_v5 }
 0x141   : > { %v393_v13 = vpop.permute.xlu0 %392 }
 0x142   : > { %687 = vmatmul.msk.f32.vlgmr.msrb.gmra.mxu1 %vm256_vm2, %v393_v13 }
 0x1b2   : > { %v278_v14 = vpop.f32.mrf.mxu1 }
 0x1b3   : > { %v281_v15 = vsel %vm256_vm2, %v278_v14, -inf }
 0x1b4   : > { %282 = vmax.xlane.f32.xlu1 %v281_v15 }
 0x1b9   : > { %v482_v16 = vpop.f32.mrf.mxu0 }
 0x1ba   : > { %v485_v17 = vsel %vm256_vm2, %v482_v16, -inf }
 0x1bb   : > { %486 = vmax.xlane.f32.xlu0 %v485_v17 }
 0x1bf   : > { %v417_v18 = vpop.f32.mrf.mxu1 }
 0x1c0   : > { %v343_v19 = vpop.f32.mrf.mxu3  ;;  %v420_v20 = vsel %vm256_vm2, %v417_v18, -inf }
 0x1c1   : > { %421 = vmax.xlane.f32.xlu1 %v420_v20  ;;  %v346_v21 = vsel %vm256_vm2, %v343_v19, -inf }
 0x1c2   : > { %347 = vmax.xlane.f32.xlu2 %v346_v21 }
 0x1cf   : > { %292 = vrot.lane.b32.xlu0 %v1109_v6, %s968_s29 }
 0x227   : > { %v283_v22 = vpop.xlane.xlu1 %282 }
 0x228   : > { %v284_v23 = vsub.f32 %v278_v14, %v283_v22 }
 0x22a   : > { %v285_v24 = vmul.f32 1.442695, %v284_v23 }
 0x22c   : > { %779 = vpow2.f32 %v285_v24 }
 0x22e   : > { %v487_v25 = vpop.xlane.xlu0 %486 }
 0x22f   : > { %v488_v26 = vsub.f32 %v482_v16, %v487_v25 }
 0x231   : > { %v489_v27 = vmul.f32 1.442695, %v488_v26 }
 0x232   : > { %v780_v28 = vpop.eup %779 }
 0x233   : > { %781 = vpow2.f32 %v489_v27  ;;  %v287_v29 = vsel %vm256_vm2, %v780_v28, 0.0 }
 0x234   : > { %288 = vadd.xlane.f32.xlu2 %v287_v29  ;;  %v422_v30 = vpop.xlane.xlu1 %421 }
 0x235   : > { %v423_v31 = vsub.f32 %v417_v18, %v422_v30  ;;  %v348_v32 = vpop.xlane.xlu2 %347 }
 0x236   : > { %v349_v33 = vsub.f32 %v343_v19, %v348_v32 }
 0x237   : > { %v424_v34 = vmul.f32 1.442695, %v423_v31 }
 0x238   : > { %v350_v35 = vmul.f32 1.442695, %v349_v33 }
 0x239   : > { %v782_v36 = vpop.eup %781  ;;  %783 = vpow2.f32 %v424_v34 }
 0x23a   : > { %785 = vpow2.f32 %v350_v35  ;;  %v491_v37 = vsel %vm256_vm2, %v782_v36, 0.0 }
 0x23b   : > { %492 = vadd.xlane.f32.xlu1 %v491_v37 }
 0x23f   : > { %v784_v38 = vpop.eup %783 }
 0x240   : > { %v786_v39 = vpop.eup %785  ;;  %v426_v40 = vsel %vm256_vm2, %v784_v38, 0.0 }
 0x241   : > { %427 = vadd.xlane.f32.xlu0 %v426_v40  ;;  %v352_v41 = vsel %vm256_vm2, %v786_v39, 0.0  ;;  %v293_v42 = vpop.permute.xlu0 %292 }
 0x242   : > { %353 = vadd.xlane.f32.xlu2 %v352_v41  ;;  %313 = vmatpush.msra.mxu2 %v293_v42 }
 0x254   : > { %496 = vrot.lane.b32.xlu1 %v1109_v6, %s969_s30  ;;  %s905_s30 = scalar_lea.hbm %s1185_s3, 16 }
 0x255   : > { %p907_p7 = scmp.lt.s32.totalorder %s905_s30, %s901_s28 }
 0x257   : > { %p908_p8 = por %p907_p7, %p906_p12 }
 0x259   : > { %p909_p9 = pnand %p908_p8, %p904_p5 }
 0x25a   : > { %357 = vrot.lane.b32.xlu2 %v1109_v6, %s970_s5 }
 0x262   : > { %431 = vrot.lane.b32.xlu2 %v1109_v6, %s971_s6 }
 0x2a7   : > { %v289_v43 = vpop.xlane.xlu2 %288 }
 0x2a8   : > { %787 = vrcp.f32 %v289_v43 }
 0x2ae   : > { %v788_v44 = vpop.eup %787  ;;  %v493_v48 = vpop.xlane.xlu1 %492 }
 0x2af   : > { %v291_v45 = vmul.f32 %v788_v44, %v780_v28 }
 0x2b1   : > { %682 = vmatmul.msk.f32.vlgmr.msra.gmra.mxu2 %vm256_vm2, %v291_v45 }
 0x2b4   : > { %v428_v47 = vpop.xlane.xlu0 %427 }
 0x2b5   : > { %v354_v46 = vpop.xlane.xlu2 %353 }
 0x2b6   : > { %789 = vrcp.f32 %v354_v46 }
 0x2b7   : > { %791 = vrcp.f32 %v428_v47 }
 0x2b8   : > { %793 = vrcp.f32 %v493_v48 }
 0x2bc   : > { %v790_v49 = vpop.eup %789 }
 0x2bd   : > { %v358_v50 = vpop.permute.xlu2 %357  ;;  %v356_v51 = vmul.f32 %v790_v49, %v786_v39  ;;  %v792_v52 = vpop.eup %791 }
 0x2be   : > { %378 = vmatpush.msrb.mxu2 %v358_v50  ;;  %v794_v53 = vpop.eup %793  ;;  %v430_v54 = vmul.f32 %v792_v52, %v784_v38 }
 0x2bf   : > { %685 = vmatmul.msk.f32.vlgmr.msrb.gmra.mxu2 %vm256_vm2, %v356_v51  ;;  %v495_v56 = vmul.f32 %v794_v53, %v782_v36 }
 0x2c5   : > { %v432_v55 = vpop.permute.xlu2 %431 }
 0x2c6   : > { %452 = vmatpush.msrb.mxu3 %v432_v55  ;;  %v497_v57 = vpop.permute.xlu1 %496 }
 0x2c7   : > { %688 = vmatmul.msk.f32.vlgmr.msrb.gmra.mxu3 %vm256_vm2, %v430_v54  ;;  %517 = vmatpush.msra.mxu2 %v497_v57 }
 0x2c8   : > { %691 = vmatmul.msk.f32.vlgmr.msra.gmra.mxu2 %vm256_vm2, %v495_v56 }
 0x334   : > { %v315_v58 = vpop.f32.mrf.mxu2 }
 0x342   : > { %v380_v59 = vpop.f32.mrf.mxu2 }
 0x343   : > { %384 = vrot.lane.b32.xlu2 %v380_v59, %s972_s17 }
 0x34a   : > { %v454_v63 = vpop.f32.mrf.mxu3 }
 0x34b   : > { %v519_v60 = vpop.f32.mrf.mxu2 }
 0x34c   : > { %523 = vrot.lane.b32.xlu1 %v519_v60, %s972_s17 }
 0x39d   : > { %v385_v61 = vpop.permute.xlu2 %384 }
 0x39e   : > { %v387_v62 = vsel %vm256_vm2, %v315_v58, %v385_v61 }
 0x39f   : > { %389 = vst.msk [vmem:[#allocation3] sm:$0xff] %vm388_vm3, %v387_v62 }
 0x3be   : > { %v524_v0 = vpop.permute.xlu1 %523 }
 0x3bf   : > { %v526_v1 = vsel %vm256_vm2, %v454_v63, %v524_v0 }
 0x3c0   : > { %528 = vrot.lane.b32.xlu1 %v526_v1, %s973_s18 }
 0x432   : > { %v529_v6 = vpop.permute.xlu1 %528 }
 0x433   : > { %532 = vst.msk [vmem:[#allocation3] sm:$0xff] %vm531_vm4, %v529_v6 }
 0x43a   : > { %v533_v7 = vld [vmem:[#allocation3] sm:$0xff] }
 0x43b   : > { %692 = vmatmul.msk.f32.vlgmr.msra.gmra.mxu1 %vm226_vm0, %v533_v7 }
 0x4b8   : > { %v558_v8 = vpop.f32.mrf.mxu1 }
 0x4b9   : > { %561 = vst.msk [vmem:[%s220_s9] sm:$0xff] %vm226_vm0, %v558_v8 }
 0x4ba   : > { %912 = shalt.err (!%p909_p9)
}
 0x4bb   : > { %707 = dma.vmem_to_hbm [thread:$0]  (%p1063_p4), %s576_s24, 128, %s578_s25, %s563_s26  }
 0x4bc PF: > { %s589_s10 = sand.u32 1, %s943_s12   ;;  %p1192_p10 = scmp.ge.s32.totalorder %s955_s15, 2 }
 0x4bd   : > { %s590_s6 = scalar_lea.sflag [#allocation6], %s589_s10 }
 0x4be   : > { %p721_p13 = pnand %p1192_p10, %p1067_p6 }
 0x4c0   : > { %p722_p11 = pneg %p721_p13 }
 0x4c2   : > { %938 = dma.done.wait (%p722_p11), %s590_s6, 128  }
 0x4c3   : > { %940 = vsyncadd (%p722_p11), %s590_s6, 4294967168  ;;  %p17_p0 = scmp.ge.s32.totalorder %s1037_s4, 4   ;;  %s1193_s12 = smov %s947_s13 }
 0x4c4   : > { %s1194_s13 = smov %s951_s14  ;;  %s1195_s14 = smov %s1048_s7 }
 0x4c5   : > { %s1196_s15 = smov %s1037_s4  ;;  %19 = sbr.rel (!%p17_p0) target bundleno = 6 (0x6), region = 85 }
 0x4ca   :  { %596 = vsyncpa [#allocation5], 1 }
 0x4cb   :  { %598 = vsyncpa [#allocation5 + $0x1], 1 }
 0x4cc   :  { %599 = vsyncpa [#allocation8], 1 }
 0x4cd   :  { %600 = vsyncpa [#allocation6], 1 }
 0x4ce   :  { %602 = vsyncpa [#allocation6 + $0x1], 1 }

</bundles_post_ra>
